<compile_context>
chip_gen: v5e
topology: v5e:2x2
jax: 0.10.0
libtpu: 0.0.40
codegen_flags: <defaults>
</compile_context>

<pallas_src>
import functools
import math

import jax
import jax.numpy as jnp
from jax.experimental import pallas as pl
from jax.experimental.pallas import tpu as pltpu


def _round_up(x, m):
    return ((x + m - 1) // m) * m


# ----------------------------------------------------------------------------
# Literal `Weight.forward`: return the (log-)weight tensor unchanged.
# Implemented as a *gridded*, lane-dense identity copy (the previous version
# pulled the whole array into VMEM as one unblocked block).
# ----------------------------------------------------------------------------
def _weight_copy_kernel(w_ref, o_ref):
    o_ref[...] = w_ref[...]


def weight_forward(*, weight, **data):
    """Pallas equivalent of pydpf Weight.forward: identity on `weight`."""
    orig_shape = weight.shape
    if weight.ndim == 0:
        return weight                                  # nothing to tile

    last = orig_shape[-1]
    rows = math.prod(orig_shape[:-1])                  # free, contiguous view
    w2 = weight.reshape(rows, last)

    itemsize = jnp.dtype(weight.dtype).itemsize
    block_budget = 4 * 1024 * 1024                     # per-block bytes
    if rows * last * itemsize <= block_budget:
        tr = rows                                      # single full block
    else:
        tr = max(8, (block_budget // (last * itemsize)) // 8 * 8)
    grid_r = pl.cdiv(rows, tr)

    out = pl.pallas_call(
        _weight_copy_kernel,
        out_shape=jax.ShapeDtypeStruct((rows, last), weight.dtype),
        grid_spec=pltpu.PrefetchScalarGridSpec(
            num_scalar_prefetch=0,
            grid=(grid_r,),
            in_specs=[pl.BlockSpec((tr, last), lambda i: (i, 0))],
            out_specs=pl.BlockSpec((tr, last), lambda i: (i, 0)),
        ),
        compiler_params=pltpu.CompilerParams(
            dimension_semantics=("parallel",)),
    )(w2)
    return out.reshape(orig_shape)


# ----------------------------------------------------------------------------
# NegLogDataLikelihood (Gaussian-KDE) kernel.
#
#   log_density(x) = logsumexp_n [ log_w_n - 0.5 * sum_d ((x_d - s_{n,d})/h_d)^2 ]
#                    - 0.5 * D * log(2*pi) - sum_d log(h_d)
#   forward = -log_density
#
# Quadratic expansion (MXU form, native (B, N, D) state layout):
#   sq_{b,n} = c_b + <s_{b,n}, wa_b> + <s_{b,n}^2, wq>
#   c_b  = sum_d (x_{b,d}/h_d)^2          (wrapper, tiny)
#   wa_b = -2 * x_b / h^2                 (wrapper, (B,1,D))
#   wq   = 1 / h^2                        (wrapper, broadcast to (B,1,D))
# ----------------------------------------------------------------------------
def _neg_log_kde_kernel(state_ref, logw_ref, wa_ref, wq_ref, c_ref,
                        out_ref, m_sc, l_sc, *, n_total, tile_n, ragged):
    k = pl.program_id(1)                 # N (reduction) axis, innermost

    @pl.when(k == 0)
    def _init():
        m_sc[...] = jnp.full_like(m_sc, -jnp.inf)
        l_sc[...] = jnp.zeros_like(l_sc)

    st = state_ref[...].astype(jnp.float32)        # (tb, tn, D) native layout
    lw = logw_ref[...].astype(jnp.float32)         # (tb, 1, tn) lane-dense
    wa = wa_ref[...]                               # (tb, 1, D)
    wq = wq_ref[...]                               # (tb, 1, D)
    c = c_ref[...]                                 # (tb, 1, 1)

    # MXU contractions over D; results keep particles on the lane axis.
    term_a = jnp.einsum('bkd,bnd->bkn', wa, st,
                        preferred_element_type=jnp.float32)        # (tb,1,tn)
    term_q = jnp.einsum('bkd,bnd->bkn', wq, st * st,
                        preferred_element_type=jnp.float32)        # (tb,1,tn)
    z = lw - 0.5 * (c + term_a + term_q)                           # (tb,1,tn)

    if ragged:
        # Mask lanes past the true particle count in the (padded) last tile.
        lane = jax.lax.broadcasted_iota(jnp.int32, z.shape, 2)
        z = jnp.where(k * tile_n + lane < n_total, z, -jnp.inf)

    # Online (streaming) logsumexp over particle tiles, guarded against
    # all -inf tiles (zero-weight particles) which would otherwise yield NaN.
    m_prev = m_sc[...]
    m_new = jnp.maximum(m_prev, jnp.max(z, axis=-1, keepdims=True))
    m_safe = jnp.where(m_new == -jnp.inf, 0.0, m_new)
    alpha = jnp.exp(m_prev - m_safe)
    l_sc[...] = alpha * l_sc[...] + jnp.sum(jnp.exp(z - m_safe),
                                            axis=-1, keepdims=True)
    m_sc[...] = m_new

    @pl.when(k == pl.num_programs(1) - 1)
    def _finalize():
        # Negative logsumexp; bandwidth-only log-normalizer applied in wrapper.
        out_ref[...] = -(m_sc[...] + jnp.log(l_sc[...]))


def _select_tiles(B, N, D, state_itemsize, weight_itemsize, tile_n,
                  budget_bytes=12 * 1024 * 1024):
    """Pick (tb, tn) so the double-buffered, lane-padded tiles fit the budget."""
    tb = B if B <= 8 else 8
    lane_d = _round_up(D, 128)

    def step_bytes(tn_):
        st = tb * _round_up(tn_, 8) * lane_d * state_itemsize
        lw = tb * 8 * _round_up(tn_, 128) * weight_itemsize
        return 2 * (st + lw)                       # double-buffered streams

    if tile_n is not None:
        tn = min(tile_n, N)
    elif N <= 128 or step_bytes(N) <= budget_bytes:
        tn = N                                     # single N step
    else:
        per_128 = step_bytes(256) - step_bytes(128)
        n128 = max(1, budget_bytes // max(per_128, 1))
        tn = min((N // 128) * 128, max(128, n128 * 128))
    return tb, tn, step_bytes(tn)


def neg_log_data_likelihood(ground_truth, state, weight, bandwidth,
                            *, tile_n=None):
    """-KDE.log_density(ground_truth, state, weight). Returns shape (B,)."""
    B, N, D = state.shape
    assert weight.shape == (B, N)
    assert ground_truth.shape == (B, D)

    tb, tn, step_bytes = _select_tiles(
        B, N, D, jnp.dtype(state.dtype).itemsize,
        jnp.dtype(weight.dtype).itemsize, tile_n)
    grid_b = pl.cdiv(B, tb)
    grid_n = pl.cdiv(N, tn)
    ragged = (grid_n * tn) != N
    # Keep the v7x-safe scoped VMEM limit (64 MiB physical) with headroom.
    vmem_limit = int(min(64 * 1024 * 1024,
                         max(32 * 1024 * 1024, step_bytes + 8 * 1024 * 1024)))

    f32 = jnp.float32
    gt = ground_truth.astype(f32)                         # tiny (B, D)
    bw = bandwidth.astype(f32)                            # (D,)
    inv_bw2 = 1.0 / (bw * bw)                             # (D,)
    wa = (-2.0 * gt * inv_bw2[None, :]).reshape(B, 1, D)  # (B,1,D)
    wq = jnp.broadcast_to(inv_bw2[None, None, :], (B, 1, D)).astype(f32)
    c = jnp.sum((gt / bw[None, :]) ** 2, axis=-1).reshape(B, 1, 1)

    # Free metadata reshape; weights stay in their native dtype.
    logw3 = weight.reshape(B, 1, N)

    kernel = functools.partial(_neg_log_kde_kernel,
                               n_total=N, tile_n=tn, ragged=ragged)

    out = pl.pallas_call(
        kernel,
        out_shape=jax.ShapeDtypeStruct((B, 1, 1), f32),
        grid_spec=pltpu.PrefetchScalarGridSpec(
            num_scalar_prefetch=0,
            grid=(grid_b, grid_n),                  # N (reduction) innermost
            in_specs=[
                pl.BlockSpec((tb, tn, D), lambda i, k: (i, k, 0)),  # state
                pl.BlockSpec((tb, 1, tn), lambda i, k: (i, 0, k)),  # log-weights
                pl.BlockSpec((tb, 1, D), lambda i, k: (i, 0, 0)),   # -2*x/h^2
                pl.BlockSpec((tb, 1, D), lambda i, k: (i, 0, 0)),   # 1/h^2
                pl.BlockSpec((tb, 1, 1), lambda i, k: (i, 0, 0)),   # sum((x/h)^2)
            ],
            out_specs=pl.BlockSpec((tb, 1, 1), lambda i, k: (i, 0, 0)),
            scratch_shapes=[
                pltpu.VMEM((tb, 1, 1), f32),   # running max
                pltpu.VMEM((tb, 1, 1), f32),   # running sum-exp
            ],
        ),
        compiler_params=pltpu.CompilerParams(
            dimension_semantics=("parallel", "arbitrary"),
            vmem_limit_bytes=vmem_limit),
    )(state, logw3, wa, wq, c)

    # Hoisted bandwidth-only log-normalizer (constant per call).
    log_norm = -0.5 * D * jnp.log(2.0 * jnp.pi) - jnp.sum(jnp.log(bw))
    return out[:, 0, 0] - log_norm


def _reference(ground_truth, state, weight, bandwidth):
    # Pure-JAX reference of the same math (sanity check).
    D = state.shape[-1]
    diff = (ground_truth[:, None, :] - state) / bandwidth[None, None, :]
    sq = jnp.sum(diff * diff, axis=-1)
    log_norm = -0.5 * D * jnp.log(2.0 * jnp.pi) - jnp.sum(jnp.log(bandwidth))
    z = weight - 0.5 * sq + log_norm
    return -jax.scipy.special.logsumexp(z, axis=-1)


if __name__ == "__main__":
    key = jax.random.PRNGKey(0)
    B, N, D = 4, 512, 8
    k_state, k_gt, k_w, k_state2, k_gt2, k_w2 = jax.random.split(key, 6)

    state = jax.random.normal(k_state, (B, N, D), dtype=jnp.float32)
    ground_truth = jax.random.normal(k_gt, (B, D), dtype=jnp.float32)
    log_weight = jax.nn.log_softmax(
        jax.random.normal(k_w, (B, N), dtype=jnp.float32), axis=-1)
    bandwidth = 0.3 + 0.05 * jnp.arange(D, dtype=jnp.float32)

    # 1) Literal Weight.forward: pass-through of the weight tensor.
    w_out = jax.block_until_ready(
        weight_forward(weight=log_weight, state=state,
                       ground_truth=ground_truth))
    assert w_out.shape == log_weight.shape
    assert jnp.array_equal(w_out, log_weight)

    # 2) KDE neg-log-likelihood, adaptive tiling (single N step here).
    out = jax.block_until_ready(
        neg_log_data_likelihood(ground_truth, state, log_weight, bandwidth))
    ref = _reference(ground_truth, state, log_weight, bandwidth)
    assert out.shape == (B,)
    assert jnp.allclose(out, ref, rtol=1e-4, atol=1e-3), (out, ref)

    # 3) Ragged particle count + forced small tile (streams 2 N tiles, masked).
    N2 = 200
    state2 = jax.random.normal(k_state2, (B, N2, D), dtype=jnp.float32)
    ground_truth2 = jax.random.normal(k_gt2, (B, D), dtype=jnp.float32)
    log_weight2 = jax.nn.log_softmax(
        jax.random.normal(k_w2, (B, N2), dtype=jnp.float32), axis=-1)
    out2 = jax.block_until_ready(
        neg_log_data_likelihood(ground_truth2, state2, log_weight2, bandwidth,
                                tile_n=128))
    ref2 = _reference(ground_truth2, state2, log_weight2, bandwidth)
    assert jnp.allclose(out2, ref2, rtol=1e-4, atol=1e-3), (out2, ref2)

    # 4) bf16 state / weights stream at half the HBM bytes (cast in-kernel).
    state_bf = state.astype(jnp.bfloat16)
    logw_bf = log_weight.astype(jnp.bfloat16)
    out_bf = jax.block_until_ready(
        neg_log_data_likelihood(ground_truth, state_bf, logw_bf, bandwidth))
    ref_bf = _reference(ground_truth, state_bf.astype(jnp.float32),
                        logw_bf.astype(jnp.float32), bandwidth)
    assert jnp.allclose(out_bf, ref_bf, rtol=1e-3, atol=2e-3), (out_bf, ref_bf)

    # 5) Degenerate all -inf log-weights: guard gives +inf (not NaN), matching
    #    the reference -logsumexp(-inf) = +inf.
    out_deg = jax.block_until_ready(
        neg_log_data_likelihood(ground_truth, state,
                                jnp.full((B, N), -jnp.inf, jnp.float32),
                                bandwidth))
    assert bool(jnp.all(jnp.isinf(out_deg) & (out_deg > 0))), out_deg

    print("KERNEL_OK")
</pallas_src>

<mosaic_0001>
module attributes {stable_mosaic.version = 11 : i64} {
  func.func @_weight_copy_kernel(%arg0: i32, %arg1: memref<4x512xf32, #tpu.memory_space<vmem>>, %arg2: memref<4x512xf32, #tpu.memory_space<vmem>>) attributes {dimension_semantics = [#tpu.dimension_semantics<parallel>], iteration_bounds = array<i64: 1>, scalar_prefetch = 0 : i64, scratch_operands = 0 : i64, tpu.core_type = #tpu.core_type<tc>, window_params = [{transform_indices = @transform_0, window_bounds = array<i64: 4, 512>}, {transform_indices = @transform_1, window_bounds = array<i64: 4, 512>}]} {
    %c0 = arith.constant 0 : index
    %c0_0 = arith.constant 0 : index
    %0 = vector.load %arg1[%c0, %c0_0] : memref<4x512xf32, #tpu.memory_space<vmem>>, vector<4x512xf32>
    %c0_1 = arith.constant 0 : index
    %c0_2 = arith.constant 0 : index
    %1 = vector.load %arg2[%c0_1, %c0_2] : memref<4x512xf32, #tpu.memory_space<vmem>>, vector<4x512xf32>
    tpu.vector_store %arg2[%c0_1, %c0_2], %0 {strides = array<i32>} : memref<4x512xf32, #tpu.memory_space<vmem>>, vector<4x512xf32>,
    return
  }
  func.func @transform_0(%arg0: i32) -> (i32, i32) {
    %c0_i32 = arith.constant 0 : i32
    %c0_i32_0 = arith.constant 0 : i32
    return %arg0, %c0_i32 : i32, i32
  }
  func.func @transform_1(%arg0: i32) -> (i32, i32) {
    %c0_i32 = arith.constant 0 : i32
    %c0_i32_0 = arith.constant 0 : i32
    return %arg0, %c0_i32 : i32, i32
  }
}

</mosaic_0001>

<bundles_post_ra>
// kernel: tpu_custom_call.1
= control target key start
LH: loop header
LB: loop body
LE: loop exit
PB: predicated region body
PF: predicated region fallthrough
CT: control target
= control target key end

     0   :  { %6 = vsyncpa [#allocation3], 0  ;;  %s116_s0 = inlined_call_operand.hbm [shape: f32[4,512], index: 0, kind: input, shape index: {}]   ;;  %s117_s1 = inlined_call_operand.hbm [shape: f32[4,512], index: 1, kind: output, shape index: {}]  }
   0x1   :  { %7 = vsyncpa [#allocation4], 0  ;;  %s13_s8 = sshll.u32 %s116_s0, 4  ;;  %s98_s9 = smov [#allocation2]   ;;  %s14_s8 = int_to_ptr.hbm [resolvable:$true] %s13_s8 }
   0x2   :  { %s15_s10 = sshll.u32 %s98_s9, 4  ;;  %s16_s10 = int_to_ptr.vmem [resolvable:$true] %s15_s10 }
   0x3   :  { %18 = dma.hbm_to_vmem [thread:$0]  %s14_s8, 256, %s16_s10, [#allocation3]  }
   0x4   :  { %94 = dma.done.wait [#allocation3], 256  }
   0x5   :  { %95 = vsyncadd [#allocation3], 4294967040  ;;  %s99_s11 = smov [#allocation5]   ;;  %s34_s15 = sshll.u32 %s117_s1, 4  ;;  %v23_v0 = vld [vmem:[#allocation2] sm:$0xff]  ;;  %v24_v1 = vld [vmem:[#allocation2 + $0x8] sm:$0xff]  ;;  %s35_s15 = int_to_ptr.hbm [resolvable:$true] %s34_s15 }
   0x6   :  { %s32_s12 = sshll.u32 %s99_s11, 4  ;;  %25 = vst [vmem:[#allocation5] sm:$0xff] %v23_v0  ;;  %s33_s12 = int_to_ptr.vmem [resolvable:$true] %s32_s12 }
   0x7   :  { %26 = vst [vmem:[#allocation5 + $0x8] sm:$0xff] %v24_v1 }
   0x8   :  { %37 = dma.vmem_to_hbm [thread:$0]  %s33_s12, 256, %s35_s15, [#allocation4]  }
   0x9   :  { %96 = dma.done.wait [#allocation4], 256  }
   0xa   :  { %97 = vsyncadd [#allocation4], 4294967040 }
   0xb   :  { %42 = vsyncpa [#allocation3], 1 }
   0xc   :  { %43 = vsyncpa [#allocation4], 1 }

</bundles_post_ra>
